<compile_context>
chip_gen: v7x
topology: tpu7x:2x2x1
jax: 0.10.0
libtpu: 0.0.40
codegen_flags: <defaults>
</compile_context>

<pallas_src>
from functools import partial

import jax
import jax.numpy as jnp
from jax import lax
from jax.experimental import pallas as pl
from jax.experimental.pallas import tpu as pltpu


def _bnn_kernel(x_ref, p_ref, o_ref):
    # p_ref is (3, Kp, tn): [0]=mu, [1]=log_sigma, [2]=eps   (bias folded in as
    # row K of each).  Sample W in (Kp, tn) layout (VPU + EUP, f32).
    w = p_ref[0] + jnp.exp(p_ref[1]) * p_ref[2]                   # (Kp, tn)

    # y = x_aug @ W   (contract x dim 1 with w dim 0) -> (Bp, tn).
    # The ones column of x_aug picks up the sampled-bias row of W, so the
    # bias add rides the MXU contraction.
    y = lax.dot_general(
        x_ref[...], w,
        dimension_numbers=(((1,), (0,)), ((), ())),
        preferred_element_type=jnp.float32,
    )
    o_ref[...] = jax.nn.sigmoid(y).astype(o_ref.dtype)            # nn.Sigmoid()


def _round_up(v, m):
    return ((v + m - 1) // m) * m


@partial(jax.jit, static_argnames=("tn_cap",))
def single_bnn_forward(x, weight_mu, weight_log_sigma, eps_w,
                       bias_mu, bias_log_sigma, eps_b, tn_cap=256):
    """x: (B, in_dim) f32.  Returns (B, out_dim) f32 = sigmoid(x @ W^T + b)."""
    B, K = x.shape
    N = weight_mu.shape[0]

    # --- Layout prep (fused under jit, off the kernel's critical path) ------
    Bp = _round_up(B, 8)                       # sublane multiple
    Kp = _round_up(K + 1, 8)                   # +1 row folds the bias in
    tn = min(tn_cap, _round_up(N, 128))        # lane-dense output tile
    Np = _round_up(N, tn)
    grid_n = Np // tn

    # x augmented with a ones column at index K (bias path), zero-padded.
    x_aug = jnp.concatenate([x, jnp.ones((B, 1), x.dtype)], axis=1)
    x_aug = jnp.pad(x_aug, ((0, Bp - B), (0, Kp - (K + 1))))

    def prep(w, b):                            # (N, K), (N,) -> (Kp, Np)
        a = jnp.concatenate([w.T, b.reshape(1, N)], axis=0)       # (K+1, N)
        return jnp.pad(a, ((0, Kp - (K + 1)), (0, Np - N)))

    # Single stacked parameter stream: (3, Kp, Np) = [mu | log_sigma | eps].
    params = jnp.stack([prep(weight_mu, bias_mu),
                        prep(weight_log_sigma, bias_log_sigma),
                        prep(eps_w, eps_b)], axis=0)

    flops = 2 * Bp * Kp * Np + 2 * Kp * Np + Bp * Np
    transcendentals = Kp * Np + Bp * Np                 # exp(reparam), sigmoid
    bytes_accessed = 4 * (Bp * Kp + 3 * Kp * Np + Bp * Np)

    out_p = pl.pallas_call(
        _bnn_kernel,
        out_shape=jax.ShapeDtypeStruct((Bp, Np), jnp.float32),
        grid=(grid_n,),
        in_specs=[
            pl.BlockSpec((Bp, Kp), lambda j: (0, 0)),      # x_aug (resident)
            pl.BlockSpec((3, Kp, tn), lambda j: (0, 0, j)),  # stacked params
        ],
        out_specs=pl.BlockSpec((Bp, tn), lambda j: (0, j)),
        compiler_params=pltpu.CompilerParams(
            dimension_semantics=("parallel",),
        ),
        cost_estimate=pl.CostEstimate(
            flops=flops,
            transcendentals=transcendentals,
            bytes_accessed=bytes_accessed,
        ),
    )(x_aug, params)

    return out_p[:B, :N]


def _reference(x, weight_mu, weight_log_sigma, eps_w, bias_mu, bias_log_sigma, eps_b):
    w = weight_mu + jnp.exp(weight_log_sigma) * eps_w
    b = bias_mu + jnp.exp(bias_log_sigma) * eps_b
    return jax.nn.sigmoid(x @ w.T + b)


if __name__ == "__main__":
    # Small shapes consistent with the module: SingleBNN(input_dim=32, output_dim=16)
    batch, input_dim, output_dim = 8, 32, 16
    prior_sigma = 0.1  # used only by the KL loss in training, not the forward pass

    key = jax.random.PRNGKey(0)
    kx, kwm, kws, kbm, kbs, kew, keb = jax.random.split(key, 7)

    x = jax.random.normal(kx, (batch, input_dim), dtype=jnp.float32)

    # Deterministic parameter init (shapes match torchbnn.BayesLinear).
    bound = 1.0 / jnp.sqrt(jnp.float32(input_dim))
    weight_mu = jax.random.uniform(kwm, (output_dim, input_dim),
                                   minval=-bound, maxval=bound, dtype=jnp.float32)
    weight_log_sigma = jnp.full((output_dim, input_dim),
                                jnp.log(prior_sigma), dtype=jnp.float32)
    bias_mu = jax.random.uniform(kbm, (output_dim,),
                                 minval=-bound, maxval=bound, dtype=jnp.float32)
    bias_log_sigma = jnp.full((output_dim,), jnp.log(prior_sigma), dtype=jnp.float32)

    # Reparameterization noise (the "Bayesian" sample for this forward pass).
    eps_w = jax.random.normal(kew, (output_dim, input_dim), dtype=jnp.float32)
    eps_b = jax.random.normal(keb, (output_dim,), dtype=jnp.float32)

    out = single_bnn_forward(x, weight_mu, weight_log_sigma, eps_w,
                             bias_mu, bias_log_sigma, eps_b)
    out = jax.block_until_ready(out)

    ref = _reference(x, weight_mu, weight_log_sigma, eps_w,
                     bias_mu, bias_log_sigma, eps_b)
    assert out.shape == (batch, output_dim)
    assert jnp.allclose(out, ref, atol=1e-5, rtol=1e-5)

    print("KERNEL_OK")
</pallas_src>

<mosaic_0001>
module attributes {stable_mosaic.version = 11 : i64} {
  func.func @_bnn_kernel(%arg0: i32, %arg1: memref<8x40xf32, #tpu.memory_space<vmem>>, %arg2: memref<3x40x128xf32, #tpu.memory_space<vmem>>, %arg3: memref<8x128xf32, #tpu.memory_space<vmem>>) attributes {dimension_semantics = [#tpu.dimension_semantics<parallel>], iteration_bounds = array<i64: 1>, scalar_prefetch = 0 : i64, scratch_operands = 0 : i64, tpu.core_type = #tpu.core_type<tc>, window_params = [{pipeline_mode = #tpu.pipeline_mode<synchronous>, transform_indices = @transform_0, window_bounds = array<i64: 8, 40>}, {transform_indices = @transform_1, window_bounds = array<i64: 3, 40, 128>}, {transform_indices = @transform_2, window_bounds = array<i64: 8, 128>}]} {
    %c0 = arith.constant 0 : index
    %c0_0 = arith.constant 0 : index
    %c0_1 = arith.constant 0 : index
    %0 = vector.load %arg2[%c0, %c0_0, %c0_1] : memref<3x40x128xf32, #tpu.memory_space<vmem>>, vector<1x40x128xf32>
    %1 = vector.shape_cast %0 : vector<1x40x128xf32> to vector<40x128xf32>
    %c1 = arith.constant 1 : index
    %c0_2 = arith.constant 0 : index
    %c0_3 = arith.constant 0 : index
    %2 = vector.load %arg2[%c1, %c0_2, %c0_3] : memref<3x40x128xf32, #tpu.memory_space<vmem>>, vector<1x40x128xf32>
    %3 = vector.shape_cast %2 : vector<1x40x128xf32> to vector<40x128xf32>
    %4 = math.exp %3 : vector<40x128xf32>
    %c2 = arith.constant 2 : index
    %c0_4 = arith.constant 0 : index
    %c0_5 = arith.constant 0 : index
    %5 = vector.load %arg2[%c2, %c0_4, %c0_5] : memref<3x40x128xf32, #tpu.memory_space<vmem>>, vector<1x40x128xf32>
    %6 = vector.shape_cast %5 : vector<1x40x128xf32> to vector<40x128xf32>
    %7 = arith.mulf %4, %6 : vector<40x128xf32>
    %8 = arith.addf %1, %7 : vector<40x128xf32>
    %c0_6 = arith.constant 0 : index
    %c0_7 = arith.constant 0 : index
    %9 = vector.load %arg1[%c0_6, %c0_7] : memref<8x40xf32, #tpu.memory_space<vmem>>, vector<8x40xf32>
    %cst = arith.constant dense<0.000000e+00> : vector<8x128xf32>
    %10 = tpu.matmul %9, %8, %cst {dimension_numbers = #tpu.dot_dimension_numbers<[1], [0], [0], [1], [0, 0, 1, 1], [], []>} : vector<8x40xf32>, vector<40x128xf32>, vector<8x128xf32> -> vector<8x128xf32>
    %11 = arith.negf %10 : vector<8x128xf32>
    %12 = math.exp %11 : vector<8x128xf32>
    %cst_8 = arith.constant 1.000000e+00 : f32
    %13 = vector.broadcast %cst_8 : f32 to vector<8x128xf32>
    %14 = arith.addf %13, %12 : vector<8x128xf32>
    %15 = arith.divf %13, %14 : vector<8x128xf32>
    %c0_9 = arith.constant 0 : index
    %c0_10 = arith.constant 0 : index
    %16 = vector.load %arg3[%c0_9, %c0_10] : memref<8x128xf32, #tpu.memory_space<vmem>>, vector<8x128xf32>
    tpu.vector_store %arg3[%c0_9, %c0_10], %15 {strides = array<i32>} : memref<8x128xf32, #tpu.memory_space<vmem>>, vector<8x128xf32>,
    return
  }
  func.func @transform_0(%arg0: i32) -> (i32, i32) {
    %c0_i32 = arith.constant 0 : i32
    %c0_i32_0 = arith.constant 0 : i32
    %c0_i32_1 = arith.constant 0 : i32
    return %c0_i32, %c0_i32_0 : i32, i32
  }
  func.func @transform_1(%arg0: i32) -> (i32, i32, i32) {
    %c0_i32 = arith.constant 0 : i32
    %c0_i32_0 = arith.constant 0 : i32
    %c0_i32_1 = arith.constant 0 : i32
    return %c0_i32, %c0_i32_0, %arg0 : i32, i32, i32
  }
  func.func @transform_2(%arg0: i32) -> (i32, i32) {
    %c0_i32 = arith.constant 0 : i32
    %c0_i32_0 = arith.constant 0 : i32
    return %c0_i32, %arg0 : i32, i32
  }
}

</mosaic_0001>

<bundles_post_ra>
// kernel: single_bnn_forward.1
= control target key start
LH: loop header
LB: loop body
LE: loop exit
PB: predicated region body
PF: predicated region fallthrough
CT: control target
= control target key end

     0   :  { %v224_v1 = vmov 0.0|0.0   ;;  %vm225_vm0 = vmmov 0   ;;  %v226_v4 = vmov 0.0   ;;  %s303_s0 = inlined_call_operand.vmem [shape: f32[8,40], index: 0, kind: input, shape index: {}]   ;;  %s304_s1 = inlined_call_operand.vmem [shape: f32[3,40,128], index: 1, kind: input, shape index: {}]   ;;  %s305_s2 = inlined_call_operand.hbm [shape: f32[8,128], index: 2, kind: output, shape index: {}]  }
   0x1   :  { %v145_v0 = vld [vmem:[%s304_s1 + $0x28] sm:$0xff]  ;;  %176 = vmatprep.subr.bf16.mxu0 %v224_v1  ;;  %v146_v2 = vld [vmem:[%s304_s1 + $0x30] sm:$0xff]  ;;  %173 = vmatprep.mubr.msk.f32.mxu0 %vm225_vm0, %v226_v4  ;;  %v147_v6 = vld [vmem:[%s304_s1 + $0x38] sm:$0xff] }
   0x2   :  { %v23_v3 = vmul.f32 1.442695, %v145_v0  ;;  %v25_v5 = vmul.f32 1.442695, %v146_v2  ;;  %v148_v7 = vld [vmem:[%s304_s1 + $0x40] sm:$0xff]  ;;  %v149_v10 = vld [vmem:[%s304_s1 + $0x48] sm:$0xff] }
   0x3   :  { %v27_v8 = vmul.f32 1.442695, %v147_v6  ;;  %v29_v9 = vmul.f32 1.442695, %v148_v7  ;;  %v31_v11 = vmul.f32 1.442695, %v149_v10 }
   0x4   :  { %186 = vpow2.f32 %v23_v3 }
   0x5   :  { %188 = vpow2.f32 %v25_v5 }
   0x6   :  { %190 = vpow2.f32 %v27_v8 }
   0x7   :  { %7 = vsyncpa [#allocation3], 0  ;;  %192 = vpow2.f32 %v29_v9  ;;  %v150_v12 = vld [vmem:[%s304_s1 + $0x50] sm:$0xff]  ;;  %v151_v13 = vld [vmem:[%s304_s1 + $0x58] sm:$0xff]  ;;  %vm50_vm1 = vcmask 326656   ;;  %s227_s13 = smov [#allocation2]  }
   0x8   :  { %194 = vpow2.f32 %v31_v11  ;;  %v12_v15 = vld [vmem:[%s304_s1] sm:$0xff]  ;;  %v13_v18 = vld [vmem:[%s304_s1 + $0x8] sm:$0xff]  ;;  %v14_v23 = vld [vmem:[%s304_s1 + $0x10] sm:$0xff]  ;;  %s137_s14 = sshll.u32 %s227_s13, 4  ;;  %s138_s14 = int_to_ptr.vmem [resolvable:$true] %s137_s14 }
   0x9   :  { %v152_v16 = vld [vmem:[%s304_s1 + $0x60] sm:$0xff]  ;;  %v153_v20 = vld [vmem:[%s304_s1 + $0x68] sm:$0xff]  ;;  %v15_v26 = vld [vmem:[%s304_s1 + $0x18] sm:$0xff]  ;;  %p205_p1 = scmp.lt.s32.totalorder %s138_s14, %s138_s14 }
   0xa   :  { %v154_v32 = vld [vmem:[%s304_s1 + $0x70] sm:$0xff]  ;;  %v16_v37 = vld [vmem:[%s304_s1 + $0x20] sm:$0xff]  ;;  %s200_s1 = scalar_lea.vmem %s138_s14, 128 }
   0xb   :  { %v49_v39 = vld [vmem:[%s303_s0] sm:$0xff]  ;;  %p201_p0 = scmp.ne.s32.totalorder %s138_s14, %s200_s1  ;;  %p206_p2 = scmp.lt.s32.totalorder %s200_s1, %s200_s1 }
   0xd   :  { %p207_p3 = por %p206_p2, %p205_p1 }
   0xe   :  { %v187_v14 = vpop.eup %186 }
   0xf   :  { %v189_v17 = vpop.eup %188  ;;  %v39_v19 = vmul.f32 %v187_v14, %v150_v12  ;;  %p208_p4 = pnand %p207_p3, %p201_p0 }
  0x10   :  { %v191_v21 = vpop.eup %190  ;;  %v40_v22 = vmul.f32 %v189_v17, %v151_v13 }
  0x11   :  { %v193_v24 = vpop.eup %192  ;;  %v44_v25 = vadd.f32 %v39_v19, %v12_v15  ;;  %v41_v27 = vmul.f32 %v191_v21, %v152_v16 }
  0x12   :  { %v45_v28 = vadd.f32 %v40_v22, %v13_v18  ;;  %v42_v29 = vmul.f32 %v193_v24, %v153_v20  ;;  %v195_v30 = vpop.eup %194 }
  0x13   :  { %v46_v31 = vadd.f32 %v41_v27, %v14_v23  ;;  %v43_v36 = vmul.f32 %v195_v30, %v154_v32 }
  0x14   :  { %v177_v33 = vpack.c.bf16 %v45_v28, %v44_v25  ;;  %v47_v34 = vadd.f32 %v42_v29, %v15_v26 }
  0x15   :  { %v48_v38 = vadd.f32 %v43_v36, %v16_v37 }
  0x16   :  { %178 = vmatpush3.bf16.msra.mxu0 %v177_v33  ;;  %v180_v35 = vpack.c.bf16 %v47_v34, %v46_v31 }
  0x17   :  { %179 = vmatprep.subr.bf16.mxu0 %v224_v1 }
  0x1a   :  { %181 = vmatpush3.bf16.msra.mxu0 %v180_v35 }
  0x1b   :  { %171 = vmatprep.subr.mxu0 %v226_v4 }
  0x1e   :  { %172 = vmatpush3.msra.mxu0 %v48_v38 }
  0x1f   :  { %174 = vmatmul.mubr.msk.f32.vlgmr.msra.gmra.mrb[0].mxu0 %vm50_vm1, %v49_v39 }
  0xf2   :  { %v120_v40 = vpop.f32.mrb[0].mxu0 }
  0xf3   :  { %v156_v41 = vmul.f32 -1.442695, %v120_v40  ;;  %v175_v42 = vpop.f32.mrb[1].mxu0 }
  0xf5   :  { %196 = vpow2.f32 %v156_v41 }
  0xff   :  { %v197_v43 = vpop.eup %196 }
 0x100   :  { %v127_v44 = vadd.f32 1.0, %v197_v43 }
 0x102   :  { %198 = vrcp.f32 %v127_v44 }
 0x10c   :  { %v199_v45 = vpop.eup %198 }
 0x10d   :  { %130 = vst [vmem:[#allocation2] sm:$0xff] %v199_v45 }
 0x10e   :  { %211 = shalt.err (!%p208_p4)
}
 0x10f   :  { %s212_s16 = scalar_lea.hbm %s305_s2, 128 }
 0x110   :  { %p213_p5 = scmp.ne.s32.totalorder %s305_s2, %s212_s16  ;;  %p216_p6 = scmp.lt.u32.totalorder %s212_s16, %s305_s2 }
 0x112   :  { %p218_p7 = pnand %p216_p6, %p213_p5 }
 0x114   :  { %221 = shalt.err (!%p218_p7)
}
 0x115   :  { %140 = dma.vmem_to_hbm [thread:$0]  %s138_s14, 128, %s305_s2, [#allocation3]  }
 0x116   :  { %222 = dma.done.wait [#allocation3], 128  }
 0x117   :  { %223 = vsyncadd [#allocation3], 4294967168 }
 0x118   :  { %144 = vsyncpa [#allocation3], 1 }

</bundles_post_ra>
